<compile_context>
chip_gen: v7x
topology: tpu7x:2x2x1
jax: 0.10.0
libtpu: 0.0.40
codegen_flags: <defaults>
</compile_context>

<pallas_src>
import jax
import jax.numpy as jnp
from jax import lax
from jax.experimental import pallas as pl
from jax.experimental.pallas import tpu as pltpu

F32_EPS = float(jnp.finfo(jnp.float32).eps)
ALPHA = 0.25
GAMMA = 2.0          # baked into the kernel as explicit squares
LANES = 128
SUBLANES = 8


def _round_up(x, m):
    return (x + m - 1) // m * m


def _make_kernel(tile, rows, nblocks, needs_mask):
    """tile, rows, nblocks are trace-time Python ints; needs_mask a Python bool."""

    def kernel(x_ref, t_ref, out_ref):
        i = pl.program_id(0)

        @pl.when(i == 0)
        def _():
            out_ref[...] = jnp.zeros_like(out_ref)

        # Upcast inside the kernel (no-op for f32 inputs; lets narrow target dtypes
        # stream straight from HBM without a wrapper-side conversion pass).
        x = x_ref[...].astype(jnp.float32)
        t = t_ref[...].astype(jnp.float32)

        # y_pred = clamp(inputs, eps, 1 - eps)
        y = jnp.clip(x, F32_EPS, 1.0 - F32_EPS)
        log_y = jnp.log(y)        # == -softplus(-logits), logits = log(y/(1-y))
        log_1my = jnp.log1p(-y)   # == log(1 - y)
        one_m_y = 1.0 - y

        # gamma == 2: explicit squares on the VPU instead of pow on the EUP.
        w_a = ALPHA * (one_m_y * one_m_y) * t
        w_b = (1.0 - ALPHA) * (y * y) * (1.0 - t)

        # Algebraically identical to the module's
        #   (log1p(exp(-|l|)) + relu(-l)) * (wa + wb) + l * wb,  l = log(y/(1-y)),
        # up to the overall sign, which is applied once on the final scalar.
        val = w_a * log_y + w_b * log_1my

        def fold(v):
            # Fold the tile into the resident (8, 128) accumulator (VALU adds only);
            # the cross-lane reduction happens once, outside the kernel.
            out_ref[...] += jnp.sum(v.reshape(tile // SUBLANES, SUBLANES, LANES), axis=0)

        if needs_mask:
            # Only the final block of the grid can contain rows past the logical end
            # of the array (Pallas pads partial blocks with undefined data); mask it
            # there and only there, so the hot path stays mask-free.
            @pl.when(i < nblocks - 1)
            def _():
                fold(val)

            @pl.when(i == nblocks - 1)
            def _():
                row = lax.broadcasted_iota(jnp.int32, (tile, LANES), 0)
                g_row = i * tile + row          # row-level compare: no flat-index overflow
                fold(jnp.where(g_row < rows, val, 0.0))
        else:
            fold(val)

    return kernel


def focal_loss(inputs, targets, *, tile_rows=4096):
    """Mean focal loss; same forward semantics as the PyTorch FocalLoss module."""
    assert inputs.shape == targets.shape
    x = inputs.reshape(-1)        # metadata-only for contiguous inputs (no HBM pass)
    t = targets.reshape(-1)
    n = x.shape[0]
    assert n > 0

    rem = n % LANES
    if rem:
        # Rare ragged case (n not a multiple of 128): pad < 128 benign elements.
        # x=0 clips to eps and t=0 gives a per-element contribution ~1e-21, far below
        # f32 resolution of the sum; the mean below divides by the true n.
        # TODO(synk): this pad is one extra HBM pass; it is only taken when n % 128 != 0.
        pad = LANES - rem
        x = jnp.pad(x, (0, pad))
        t = jnp.pad(t, (0, pad))

    rows = x.shape[0] // LANES
    x = x.reshape(rows, LANES)
    t = t.reshape(rows, LANES)

    # Tile rows: big enough to amortize per-step overhead, clamped (to a multiple of 8)
    # for small inputs.  4096 rows -> 2 MiB/input/buffer -> 8 MiB double-buffered,
    # within the default scoped-VMEM limit on v5e/v6e/v7x.
    tile = min(_round_up(tile_rows, SUBLANES), _round_up(rows, SUBLANES))
    nblocks = pl.cdiv(rows, tile)
    needs_mask = (rows % tile) != 0

    kernel = _make_kernel(tile, rows, nblocks, needs_mask)

    bytes_in = x.size * x.dtype.itemsize + t.size * t.dtype.itemsize
    partial = pl.pallas_call(
        kernel,
        out_shape=jax.ShapeDtypeStruct((SUBLANES, LANES), jnp.float32),
        grid_spec=pltpu.PrefetchScalarGridSpec(
            num_scalar_prefetch=0,
            grid=(nblocks,),
            in_specs=[
                pl.BlockSpec((tile, LANES), lambda i: (i, 0)),
                pl.BlockSpec((tile, LANES), lambda i: (i, 0)),
            ],
            out_specs=pl.BlockSpec((SUBLANES, LANES), lambda i: (0, 0)),
        ),
        compiler_params=pltpu.CompilerParams(
            dimension_semantics=("arbitrary",),
        ),
        cost_estimate=pl.CostEstimate(
            flops=12 * n,
            transcendentals=2 * n,
            bytes_accessed=bytes_in + SUBLANES * LANES * 4,
        ),
    )(x, t)

    # Tiny final cross-lane reduction (1024 partials) + hoisted negation + mean
    # with the true (unpadded) element count.
    return -jnp.sum(partial) / n


def _focal_loss_ref(inputs, targets):
    # Direct transcription of the PyTorch module's math.
    y = jnp.clip(inputs, F32_EPS, 1.0 - F32_EPS)
    logits = jnp.log(y / (1.0 - y))
    wa = ALPHA * (1.0 - y) ** GAMMA * targets
    wb = (1.0 - ALPHA) * y ** GAMMA * (1.0 - targets)
    loss = (jnp.log1p(jnp.exp(-jnp.abs(logits))) + jnp.maximum(-logits, 0.0)) * (wa + wb) \
           + logits * wb
    return jnp.mean(loss)


if __name__ == "__main__":
    key = jax.random.PRNGKey(0)
    k1, k2 = jax.random.split(key)
    # Inputs are probabilities in (0, 1) (the module clamps to [eps, 1-eps]);
    # targets are binary labels stored as float (module multiplies them).
    inputs = jax.random.uniform(k1, (2, 4, 16, 16), dtype=jnp.float32)
    targets = (jax.random.uniform(k2, (2, 4, 16, 16)) > 0.5).astype(jnp.float32)

    out = jax.jit(focal_loss)(inputs, targets)
    out = jax.block_until_ready(out)

    ref = _focal_loss_ref(inputs, targets)
    assert jnp.allclose(out, ref, rtol=2e-5, atol=1e-6), (out, ref)
    print("KERNEL_OK")
</pallas_src>

<mosaic_0001>
module attributes {stable_mosaic.version = 11 : i64} {
  func.func @kernel(%arg0: i32, %arg1: memref<16x128xf32, #tpu.memory_space<vmem>>, %arg2: memref<16x128xf32, #tpu.memory_space<vmem>>, %arg3: memref<8x128xf32, #tpu.memory_space<vmem>>) attributes {dimension_semantics = [#tpu.dimension_semantics<arbitrary>], iteration_bounds = array<i64: 1>, scalar_prefetch = 0 : i64, scratch_operands = 0 : i64, tpu.core_type = #tpu.core_type<tc>, window_params = [{transform_indices = @transform_0, window_bounds = array<i64: 16, 128>}, {transform_indices = @transform_1, window_bounds = array<i64: 16, 128>}, {pipeline_mode = #tpu.pipeline_mode<synchronous>, transform_indices = @transform_2, window_bounds = array<i64: 8, 128>}]} {
    %c0_i32 = arith.constant 0 : i32
    %0 = arith.cmpi eq, %arg0, %c0_i32 : i32
    %1 = arith.extui %0 : i1 to i32
    %c0_i32_0 = arith.constant 0 : i32
    %2 = arith.cmpi ne, %1, %c0_i32_0 : i32
    scf.if %2 {
      %cst_15 = arith.constant 0.000000e+00 : f32
      %33 = vector.broadcast %cst_15 : f32 to vector<8x128xf32>
      %c0_16 = arith.constant 0 : index
      %c0_17 = arith.constant 0 : index
      %34 = vector.load %arg3[%c0_16, %c0_17] : memref<8x128xf32, #tpu.memory_space<vmem>>, vector<8x128xf32>
      tpu.vector_store %arg3[%c0_16, %c0_17], %33 {strides = array<i32>} : memref<8x128xf32, #tpu.memory_space<vmem>>, vector<8x128xf32>,
    } else {
    }
    %c0 = arith.constant 0 : index
    %c0_1 = arith.constant 0 : index
    %3 = vector.load %arg1[%c0, %c0_1] : memref<16x128xf32, #tpu.memory_space<vmem>>, vector<16x128xf32>
    %c0_2 = arith.constant 0 : index
    %c0_3 = arith.constant 0 : index
    %4 = vector.load %arg2[%c0_2, %c0_3] : memref<16x128xf32, #tpu.memory_space<vmem>>, vector<16x128xf32>
    %cst = arith.constant 1.1920929E-7 : f32
    %cst_4 = arith.constant 0.99999988 : f32
    %5 = vector.broadcast %cst : f32 to vector<16x128xf32>
    %6 = arith.maximumf %5, %3 : vector<16x128xf32>
    %7 = vector.broadcast %cst_4 : f32 to vector<16x128xf32>
    %8 = arith.minimumf %7, %6 : vector<16x128xf32>
    %9 = math.log %8 : vector<16x128xf32>
    %cst_5 = arith.constant 0.000000e+00 : f32
    %10 = vector.broadcast %cst_5 : f32 to vector<16x128xf32>
    %11 = arith.subf %10, %8 : vector<16x128xf32>
    %12 = math.log1p %11 : vector<16x128xf32>
    %cst_6 = arith.constant 1.000000e+00 : f32
    %13 = vector.broadcast %cst_6 : f32 to vector<16x128xf32>
    %14 = arith.subf %13, %8 : vector<16x128xf32>
    %15 = arith.mulf %14, %14 : vector<16x128xf32>
    %cst_7 = arith.constant 2.500000e-01 : f32
    %16 = vector.broadcast %cst_7 : f32 to vector<16x128xf32>
    %17 = arith.mulf %16, %15 : vector<16x128xf32>
    %18 = arith.mulf %17, %4 : vector<16x128xf32>
    %19 = arith.mulf %8, %8 : vector<16x128xf32>
    %cst_8 = arith.constant 7.500000e-01 : f32
    %20 = vector.broadcast %cst_8 : f32 to vector<16x128xf32>
    %21 = arith.mulf %20, %19 : vector<16x128xf32>
    %cst_9 = arith.constant 1.000000e+00 : f32
    %22 = vector.broadcast %cst_9 : f32 to vector<16x128xf32>
    %23 = arith.subf %22, %4 : vector<16x128xf32>
    %24 = arith.mulf %21, %23 : vector<16x128xf32>
    %25 = arith.mulf %18, %9 : vector<16x128xf32>
    %26 = arith.mulf %24, %12 : vector<16x128xf32>
    %27 = arith.addf %25, %26 : vector<16x128xf32>
    %c0_10 = arith.constant 0 : index
    %c0_11 = arith.constant 0 : index
    %28 = vector.load %arg3[%c0_10, %c0_11] : memref<8x128xf32, #tpu.memory_space<vmem>>, vector<8x128xf32>
    %29 = vector.shape_cast %27 : vector<16x128xf32> to vector<2x8x128xf32>
    %cst_12 = arith.constant dense<0.000000e+00> : vector<8x128xf32>
    %30 = vector.multi_reduction <add>, %29, %cst_12 [0] : vector<2x8x128xf32> to vector<8x128xf32>
    %31 = arith.addf %28, %30 : vector<8x128xf32>
    %c0_13 = arith.constant 0 : index
    %c0_14 = arith.constant 0 : index
    %32 = vector.load %arg3[%c0_13, %c0_14] : memref<8x128xf32, #tpu.memory_space<vmem>>, vector<8x128xf32>
    tpu.vector_store %arg3[%c0_13, %c0_14], %31 {strides = array<i32>} : memref<8x128xf32, #tpu.memory_space<vmem>>, vector<8x128xf32>,
    return
  }
  func.func @transform_0(%arg0: i32) -> (i32, i32) {
    %c0_i32 = arith.constant 0 : i32
    %c0_i32_0 = arith.constant 0 : i32
    return %arg0, %c0_i32 : i32, i32
  }
  func.func @transform_1(%arg0: i32) -> (i32, i32) {
    %c0_i32 = arith.constant 0 : i32
    %c0_i32_0 = arith.constant 0 : i32
    return %arg0, %c0_i32 : i32, i32
  }
  func.func @transform_2(%arg0: i32) -> (i32, i32) {
    %c0_i32 = arith.constant 0 : i32
    %c0_i32_0 = arith.constant 0 : i32
    %c0_i32_1 = arith.constant 0 : i32
    return %c0_i32, %c0_i32_0 : i32, i32
  }
}

</mosaic_0001>

<bundles_post_ra>
// kernel: focal_loss.1
= control target key start
LH: loop header
LB: loop body
LE: loop exit
PB: predicated region body
PF: predicated region fallthrough
CT: control target
= control target key end

     0   :  { %s117_s0 = inlined_call_operand.vmem [shape: f32[16,128], index: 0, kind: input, shape index: {}]   ;;  %s118_s1 = inlined_call_operand.vmem [shape: f32[16,128], index: 1, kind: input, shape index: {}]   ;;  %s119_s2 = inlined_call_operand.vmem [shape: f32[8,128], index: 2, kind: output, shape index: {}]  }
   0x1   :  { %v16_v0 = vld [vmem:[%s117_s0] sm:$0xff]  ;;  %v17_v1 = vld [vmem:[%s117_s0 + $0x8] sm:$0xff] }
   0x2   :  { %v20_v2 = vmax.f32 %v16_v0, 1.1920929e-07  ;;  %v21_v3 = vmax.f32 %v17_v1, 1.1920929e-07  ;;  %v18_v17 = vld [vmem:[%s118_s1] sm:$0xff]  ;;  %v19_v19 = vld [vmem:[%s118_s1 + $0x8] sm:$0xff] }
   0x3   :  { %v60_v27 = vsub.f32 1.0, %v18_v17  ;;  %v61_v31 = vsub.f32 1.0, %v19_v19 }
   0x4   :  { %v22_v4 = vmin.f32 %v20_v2, 0.9999999  ;;  %v23_v5 = vmin.f32 %v21_v3, 0.9999999 }
   0x6   :  { %79 = vlog2.f32 %v22_v4  ;;  %v28_v6 = vsub.f32 0.0, %v22_v4  ;;  %v29_v7 = vsub.f32 0.0, %v23_v5  ;;  %v48_v8 = vsub.f32 1.0, %v22_v4 }
   0x7   :  { %81 = vlog2.f32 %v23_v5  ;;  %v49_v9 = vsub.f32 1.0, %v23_v5  ;;  %v56_v16 = vmul.f32 %v22_v4, %v22_v4  ;;  %v57_v18 = vmul.f32 %v23_v5, %v23_v5 }
   0x8   :  { %v30_v10 = vadd.f32 1.0, %v28_v6  ;;  %v39_v11 = vadd.f32 1.0, %v29_v7  ;;  %v50_v12 = vmul.f32 %v48_v8, %v48_v8  ;;  %v33_v13 = vmul.f32 -0.5, %v28_v6 }
   0x9   :  { %v51_v14 = vmul.f32 %v49_v9, %v49_v9  ;;  %v42_v15 = vmul.f32 -0.5, %v29_v7  ;;  %v36_v24 = vand.u32 2147483647, %v28_v6  ;;  %v58_v26 = vmul.f32 0.75, %v56_v16 }
   0xa   :  { %83 = vlog2.f32 %v30_v10  ;;  %v52_v20 = vmul.f32 0.25, %v50_v12  ;;  %v34_v21 = vadd.f32 1.0, %v33_v13  ;;  %v45_v29 = vand.u32 2147483647, %v29_v7 }
   0xb   :  { %85 = vlog2.f32 %v39_v11  ;;  %v53_v22 = vmul.f32 0.25, %v51_v14  ;;  %v43_v25 = vadd.f32 1.0, %v42_v15  ;;  %v59_v30 = vmul.f32 0.75, %v57_v18 }
   0xc   :  { %v54_v33 = vmul.f32 %v52_v20, %v18_v17  ;;  %v35_v35 = vmul.f32 %v34_v21, %v28_v6  ;;  %vm37_vm0 = vcmp.lt.f32.partialorder %v36_v24, 0.0004427343  ;;  %v62_v39 = vmul.f32 %v60_v27, %v58_v26 }
   0xd   :  { %v55_v36 = vmul.f32 %v53_v22, %v19_v19  ;;  %v44_v38 = vmul.f32 %v43_v25, %v29_v7  ;;  %vm46_vm1 = vcmp.lt.f32.partialorder %v45_v29, 0.0004427343  ;;  %v63_v42 = vmul.f32 %v61_v31, %v59_v30 }
  0x10   :  { %v80_v23 = vpop.eup %79 }
  0x11   :  { %v82_v28 = vpop.eup %81  ;;  %v25_v32 = vmul.f32 0.6931472, %v80_v23 }
  0x12   :  { %v27_v34 = vmul.f32 0.6931472, %v82_v28 }
  0x13   :  { %v64_v44 = vmul.f32 %v54_v33, %v25_v32 }
  0x14   :  { %v84_v37 = vpop.eup %83  ;;  %v65_v46 = vmul.f32 %v55_v36, %v27_v34 }
  0x15   :  { %v86_v40 = vpop.eup %85  ;;  %v32_v41 = vmul.f32 0.6931472, %v84_v37 }
  0x16   :  { %v41_v43 = vmul.f32 0.6931472, %v86_v40 }
  0x17   :  { %v38_v45 = vsel %vm37_vm0, %v35_v35, %v32_v41 }
  0x18   :  { %v47_v47 = vsel %vm46_vm1, %v44_v38, %v41_v43  ;;  %v66_v48 = vmul.f32 %v62_v39, %v38_v45 }
  0x19   :  { %v67_v49 = vmul.f32 %v63_v42, %v47_v47 }
  0x1a   :  { %v68_v50 = vadd.f32 %v66_v48, %v64_v44 }
  0x1b   :  { %v69_v51 = vadd.f32 %v67_v49, %v65_v46 }
  0x1d   :  { %v71_v52 = vadd.f32 %v69_v51, %v68_v50 }
  0x1f   :  { %73 = vst [vmem:[%s119_s2] sm:$0xff] %v71_v52 }

</bundles_post_ra>
